<compile_context>
chip_gen: v7x
topology: tpu7x:2x2x1
jax: 0.10.0
libtpu: 0.0.40
codegen_flags: <defaults>
</compile_context>

<pallas_src>
import functools

import jax
import jax.numpy as jnp
from jax.experimental import pallas as pl
from jax.experimental.pallas import tpu as pltpu


_BLOCK_BYTES = 4 << 20  # ~4 MiB of input bytes per block in the tiled path


def _cdiv(a, b):
    return (a + b - 1) // b


def _round_up(a, b):
    return _cdiv(a, b) * b


def _tpu_limits():
    """Returns (vmem_limit_bytes, fused_single_pass_threshold_in_f32_bytes)."""
    cap = 64 << 20  # conservative default = v7x per-TC physical VMEM
    try:
        info = pltpu.get_tpu_info()
        cap = int(getattr(info, "vmem_capacity_bytes", cap) or cap)
    except Exception:
        pass
    if cap >= (128 << 20):          # v5e / v6e: 128 MiB physical VMEM
        return 64 << 20, 12 << 20
    return 40 << 20, 6 << 20        # v7x: 64 MiB per TensorCore


# ----------------------------------------------------------------------------
# Kernels
# ----------------------------------------------------------------------------
def _fused_small_kernel(x_ref, o_ref, *, num_bits):
    """Whole-array block: min/max + scale + quantize in one VMEM-resident pass."""
    x = x_ref[...].astype(jnp.float32)
    # Degenerate max == min gives scale = inf (matches the torch reference).
    scale = (2.0 ** num_bits - 1.0) / (jnp.max(x) - jnp.min(x))
    qmin = float(-(2 ** (num_bits - 1) + 1))
    qmax = float(2 ** (num_bits - 1))
    y = jnp.clip(x * scale, qmin, qmax)
    o_ref[...] = (jnp.round(y) / scale).astype(o_ref.dtype)


def _minmax_partial_kernel(x_ref, min_ref, max_ref, *, rows, tm):
    """Per-block min/max folded down to a single (8, 128) f32 partial."""
    x = x_ref[...]                       # native dtype: no full-block upcast
    block_rows, lane = x.shape
    if (rows % tm) != 0:
        # Ragged last block: mask out-of-bounds rows with +/- inf.
        i = pl.program_id(0)
        valid = rows - i * tm            # >= tm for every block but the last
        row_ids = jax.lax.broadcasted_iota(jnp.int32, x.shape, 0)
        in_bounds = row_ids < valid
        x_min = jnp.where(in_bounds, x, jnp.inf)
        x_max = jnp.where(in_bounds, x, -jnp.inf)
    else:
        x_min = x
        x_max = x
    # Sublane-group fold (layout-preserving reshape) -> (8, lane); pure VALU.
    pmin = jnp.min(x_min.reshape(block_rows // 8, 8, lane), axis=0)
    pmax = jnp.max(x_max.reshape(block_rows // 8, 8, lane), axis=0)
    # Lane-group fold -> (8, 128) via vreg-aligned static slices (VALU min/max).
    fmin = pmin[:, 0:128]
    fmax = pmax[:, 0:128]
    for g in range(1, lane // 128):
        fmin = jnp.minimum(fmin, pmin[:, g * 128:(g + 1) * 128])
        fmax = jnp.maximum(fmax, pmax[:, g * 128:(g + 1) * 128])
    min_ref[0] = fmin.astype(jnp.float32)
    max_ref[0] = fmax.astype(jnp.float32)


def _quantize_kernel(scale_ref, x_ref, o_ref, *, num_bits):
    """Elementwise: round(clip(x*scale)) / scale, casts fused in/out."""
    scale = scale_ref[0]                 # scalar-prefetched f32 in SMEM
    qmin = float(-(2 ** (num_bits - 1) + 1))
    qmax = float(2 ** (num_bits - 1))
    y = jnp.clip(x_ref[...].astype(jnp.float32) * scale, qmin, qmax)
    # True divide: bit-consistent with the fused small path and torch reference.
    o_ref[...] = (jnp.round(y) / scale).astype(o_ref.dtype)


# ----------------------------------------------------------------------------
# Wrapper
# ----------------------------------------------------------------------------
def _pick_tile_rows(rows, lane, itemsize):
    """Rows per block: multiple of 8, ~4 MiB of input bytes, >= 2 blocks."""
    tm = max(8, ((_BLOCK_BYTES // (itemsize * lane)) // 8) * 8)
    tm = min(tm, _round_up(rows, 8))
    if rows > 8:
        # Keep at least two blocks so the "parallel" grid can feed both v7x TCs.
        tm = min(tm, _round_up(_cdiv(rows, 2), 8))
    return max(tm, 8)


def module_quantize(x, num_bits=4):
    """JAX/Pallas equivalent of Module_Quantize(QMode.DET, num_bits)(x)."""
    # TODO(synk): stochastic QMode (rand-noise) path not implemented; DET only.
    orig_shape = x.shape
    orig_dtype = x.dtype
    flat = x.reshape(-1)
    n = flat.size
    itemsize = jnp.dtype(orig_dtype).itemsize

    vmem_limit, small_bytes = _tpu_limits()

    # Lane-dense 2-D view: widest multiple-of-128 lane width dividing n.
    lane = 0
    for cand in (2048, 1024, 512, 256, 128):
        if n % cand == 0:
            lane = cand
            break
    pad = 0
    if lane == 0:
        # TODO(synk): n not divisible by 128 still pays one pad copy + one slice
        # copy; rare for NN tensors (row raggedness is handled in-kernel).
        lane = 128
        pad = (-n) % lane
    if pad:
        # Edge-pad with an existing element so global min/max are unaffected.
        flat = jnp.concatenate([flat, jnp.full((pad,), flat[0], flat.dtype)])
    rows = (n + pad) // lane
    x2 = flat.reshape(rows, lane)

    small = (n * 4) <= small_bytes

    if small:
        out2 = pl.pallas_call(
            functools.partial(_fused_small_kernel, num_bits=num_bits),
            out_shape=jax.ShapeDtypeStruct((rows, lane), orig_dtype),
            compiler_params=pltpu.CompilerParams(vmem_limit_bytes=vmem_limit),
        )(x2)
    else:
        tm = _pick_tile_rows(rows, lane, itemsize)
        nb = _cdiv(rows, tm)

        # Pass 1: per-block (8, 128) min/max partials ("parallel" -> both TCs).
        pmin, pmax = pl.pallas_call(
            functools.partial(_minmax_partial_kernel, rows=rows, tm=tm),
            out_shape=(
                jax.ShapeDtypeStruct((nb, 8, 128), jnp.float32),
                jax.ShapeDtypeStruct((nb, 8, 128), jnp.float32),
            ),
            grid_spec=pltpu.PrefetchScalarGridSpec(
                num_scalar_prefetch=0,
                grid=(nb,),
                in_specs=[pl.BlockSpec((tm, lane), lambda i: (i, 0))],
                out_specs=[
                    pl.BlockSpec((1, 8, 128), lambda i: (i, 0, 0)),
                    pl.BlockSpec((1, 8, 128), lambda i: (i, 0, 0)),
                ],
            ),
            compiler_params=pltpu.CompilerParams(
                dimension_semantics=("parallel",),
                vmem_limit_bytes=vmem_limit,
            ),
        )(x2)

        # Tiny final reduce + scale glue in plain JAX (a few KiB).
        xmin = jnp.min(pmin)
        xmax = jnp.max(pmax)
        scale = (float(2 ** num_bits - 1) / (xmax - xmin)).astype(jnp.float32)
        sc = scale.reshape(1)

        # Pass 2: elementwise quantize; scale scalar-prefetched into SMEM once.
        out2 = pl.pallas_call(
            functools.partial(_quantize_kernel, num_bits=num_bits),
            out_shape=jax.ShapeDtypeStruct((rows, lane), orig_dtype),
            grid_spec=pltpu.PrefetchScalarGridSpec(
                num_scalar_prefetch=1,
                grid=(nb,),
                in_specs=[pl.BlockSpec((tm, lane), lambda i, sc: (i, 0))],
                out_specs=pl.BlockSpec((tm, lane), lambda i, sc: (i, 0)),
            ),
            compiler_params=pltpu.CompilerParams(
                dimension_semantics=("parallel",),
                vmem_limit_bytes=vmem_limit,
            ),
        )(sc, x2)

    out_flat = out2.reshape(-1)
    if pad:
        out_flat = out_flat[:n]
    return out_flat.reshape(orig_shape)


# ----------------------------------------------------------------------------
# Reference + demo
# ----------------------------------------------------------------------------
def _reference(x, num_bits=4):
    xf = x.astype(jnp.float32)
    scale = (2 ** num_bits - 1) / (jnp.max(xf) - jnp.min(xf))
    y = jnp.clip(xf * scale, -(2 ** (num_bits - 1) + 1), 2 ** (num_bits - 1))
    return (jnp.round(y) / scale).astype(x.dtype)


if __name__ == "__main__":
    num_bits = 4
    quantize_fn = jax.jit(functools.partial(module_quantize, num_bits=num_bits))

    # Small NCHW input (fused single-block fast path).
    x_small = jax.random.normal(jax.random.PRNGKey(0), (2, 4, 16, 16),
                                dtype=jnp.float32)
    out_small = jax.block_until_ready(quantize_fn(x_small))
    ref_small = _reference(x_small, num_bits=num_bits)
    assert out_small.shape == x_small.shape and out_small.dtype == x_small.dtype
    assert jnp.allclose(out_small, ref_small, atol=1e-6, rtol=1e-6)

    # Larger input exercising the tiled two-pass path (divisible rows).
    x_big = jax.random.normal(jax.random.PRNGKey(1), (8, 32, 128, 128),
                              dtype=jnp.float32)
    out_big = jax.block_until_ready(quantize_fn(x_big))
    ref_big = _reference(x_big, num_bits=num_bits)
    assert out_big.shape == x_big.shape and out_big.dtype == x_big.dtype
    assert jnp.allclose(out_big, ref_big, atol=1e-5, rtol=1e-5)

    # Ragged row count (rows % tile_rows != 0): exercises in-kernel masking.
    x_rag = jax.random.normal(jax.random.PRNGKey(2), (2056, 2048),
                              dtype=jnp.float32)
    out_rag = jax.block_until_ready(quantize_fn(x_rag))
    ref_rag = _reference(x_rag, num_bits=num_bits)
    assert out_rag.shape == x_rag.shape and out_rag.dtype == x_rag.dtype
    assert jnp.allclose(out_rag, ref_rag, atol=1e-5, rtol=1e-5)

    print("KERNEL_OK")
</pallas_src>

<mosaic_0001>
module attributes {stable_mosaic.version = 11 : i64} {
  func.func @_fused_small_kernel(%arg0: memref<1x2048xf32, #tpu.memory_space<vmem>>, %arg1: memref<1x2048xf32, #tpu.memory_space<vmem>>) attributes {dimension_semantics = [], scalar_prefetch = 0 : i64, scratch_operands = 0 : i64, tpu.core_type = #tpu.core_type<tc>} {
    %c0 = arith.constant 0 : index
    %c0_0 = arith.constant 0 : index
    %0 = vector.load %arg0[%c0, %c0_0] : memref<1x2048xf32, #tpu.memory_space<vmem>>, vector<1x2048xf32>
    %1 = vector.shape_cast %0 : vector<1x2048xf32> to vector<1x1x2048xf32>
    %cst = arith.constant dense<0xFF800000> : vector<1xf32>
    %2 = vector.multi_reduction <maximumf>, %1, %cst [1, 2] : vector<1x1x2048xf32> to vector<1xf32>
    %3 = vector.shape_cast %2 : vector<1xf32> to vector<1x1x1xf32>
    %4 = vector.extract %3[0, 0, 0] : f32 from vector<1x1x1xf32>
    %5 = vector.shape_cast %0 : vector<1x2048xf32> to vector<1x1x2048xf32>
    %cst_1 = arith.constant dense<0x7F800000> : vector<1xf32>
    %6 = vector.multi_reduction <minimumf>, %5, %cst_1 [1, 2] : vector<1x1x2048xf32> to vector<1xf32>
    %7 = vector.shape_cast %6 : vector<1xf32> to vector<1x1x1xf32>
    %8 = vector.extract %7[0, 0, 0] : f32 from vector<1x1x1xf32>
    %9 = arith.subf %4, %8 : f32
    %cst_2 = arith.constant 1.500000e+01 : f32
    %10 = arith.divf %cst_2, %9 : f32
    %11 = vector.broadcast %10 : f32 to vector<1x2048xf32>
    %12 = arith.mulf %0, %11 : vector<1x2048xf32>
    %cst_3 = arith.constant -9.000000e+00 : f32
    %cst_4 = arith.constant 8.000000e+00 : f32
    %13 = vector.broadcast %cst_3 : f32 to vector<1x2048xf32>
    %14 = arith.maximumf %13, %12 : vector<1x2048xf32>
    %15 = vector.broadcast %cst_4 : f32 to vector<1x2048xf32>
    %16 = arith.minimumf %15, %14 : vector<1x2048xf32>
    %17 = math.roundeven %16 : vector<1x2048xf32>
    %18 = vector.broadcast %10 : f32 to vector<1x2048xf32>
    %19 = arith.divf %17, %18 : vector<1x2048xf32>
    %c0_5 = arith.constant 0 : index
    %c0_6 = arith.constant 0 : index
    %20 = vector.load %arg1[%c0_5, %c0_6] : memref<1x2048xf32, #tpu.memory_space<vmem>>, vector<1x2048xf32>
    tpu.vector_store %arg1[%c0_5, %c0_6], %19 {strides = array<i32>} : memref<1x2048xf32, #tpu.memory_space<vmem>>, vector<1x2048xf32>,
    return
  }
}

</mosaic_0001>

<bundles_post_ra>
// kernel: module_quantize.1
= control target key start
LH: loop header
LB: loop body
LE: loop exit
PB: predicated region body
PF: predicated region fallthrough
CT: control target
= control target key end

     0   :  { %v12_v0 = vlaneseq  ;;  %vm92_vm0 = vcmask 1040384   ;;  %s284_s0 = inlined_call_operand.vmem [shape: f32[1,2048], index: 0, kind: input, shape index: {}]   ;;  %s285_s1 = inlined_call_operand.vmem [shape: f32[1,2048], index: 1, kind: output, shape index: {}]  }
   0x1   :  { %v221_v2 = vld [vmem:[%s284_s0] sm:$0xff]  ;;  %v226_v7 = vld [vmem:[%s284_s0 + $0x8] sm:$0xff] }
   0x2   :  { %v13_v1 = vshrl.u32 %v12_v0, 7 }
   0x4   :  { %v14_v3 = vsub.s32 0, %v13_v1  ;;  %v18_v4 = vsub.s32 1, %v13_v1  ;;  %v22_v5 = vsub.s32 2, %v13_v1  ;;  %v26_v6 = vsub.s32 3, %v13_v1 }
   0x5   :  { %v30_v8 = vsub.s32 4, %v13_v1  ;;  %v34_v9 = vsub.s32 5, %v13_v1  ;;  %v38_v10 = vsub.s32 6, %v13_v1  ;;  %v42_v11 = vsub.s32 7, %v13_v1 }
   0x6   :  { %v15_v12 = vrot.slane %v221_v2, %v14_v3  ;;  %v19_v13 = vrot.slane %v221_v2, %v18_v4  ;;  %v23_v14 = vrot.slane %v221_v2, %v22_v5  ;;  %v27_v15 = vrot.slane %v221_v2, %v26_v6 }
   0x7   :  { %v31_v16 = vrot.slane %v221_v2, %v30_v8  ;;  %v35_v17 = vrot.slane %v221_v2, %v34_v9  ;;  %v39_v18 = vrot.slane %v221_v2, %v38_v10  ;;  %v43_v19 = vrot.slane %v221_v2, %v42_v11 }
   0x8   :  { %v47_v20 = vrot.slane %v226_v7, %v14_v3  ;;  %v51_v21 = vrot.slane %v226_v7, %v18_v4  ;;  %v55_v22 = vrot.slane %v226_v7, %v22_v5  ;;  %v59_v23 = vrot.slane %v226_v7, %v26_v6 }
   0x9   :  { %v63_v24 = vrot.slane %v226_v7, %v30_v8  ;;  %v67_v25 = vrot.slane %v226_v7, %v34_v9  ;;  %v71_v26 = vrot.slane %v226_v7, %v38_v10  ;;  %v75_v27 = vrot.slane %v226_v7, %v42_v11 }
   0xa   :  { %v93_v28 = vsel %vm92_vm0, %v15_v12, -inf  ;;  %v94_v29 = vsel %vm92_vm0, %v19_v13, -inf  ;;  %v95_v30 = vsel %vm92_vm0, %v23_v14, -inf  ;;  %v96_v31 = vsel %vm92_vm0, %v27_v15, -inf }
   0xb   :  { %v97_v32 = vsel %vm92_vm0, %v31_v16, -inf  ;;  %v99_v33 = vsel %vm92_vm0, %v35_v17, -inf  ;;  %v101_v34 = vsel %vm92_vm0, %v39_v18, -inf  ;;  %v103_v35 = vsel %vm92_vm0, %v43_v19, -inf }
   0xc   :  { %v98_v36 = vmax.f32 %v93_v28, %v97_v32  ;;  %v100_v37 = vmax.f32 %v94_v29, %v99_v33  ;;  %v102_v38 = vmax.f32 %v95_v30, %v101_v34  ;;  %v104_v39 = vmax.f32 %v96_v31, %v103_v35 }
   0xd   :  { %v105_v40 = vsel %vm92_vm0, %v47_v20, -inf  ;;  %v107_v41 = vsel %vm92_vm0, %v51_v21, -inf  ;;  %v109_v42 = vsel %vm92_vm0, %v55_v22, -inf  ;;  %v111_v43 = vsel %vm92_vm0, %v59_v23, -inf }
   0xe   :  { %v106_v44 = vmax.f32 %v98_v36, %v105_v40  ;;  %v108_v45 = vmax.f32 %v100_v37, %v107_v41  ;;  %v110_v46 = vmax.f32 %v102_v38, %v109_v42  ;;  %v112_v47 = vmax.f32 %v104_v39, %v111_v43 }
   0xf   :  { %v113_v48 = vsel %vm92_vm0, %v63_v24, -inf  ;;  %v115_v49 = vsel %vm92_vm0, %v67_v25, -inf  ;;  %v117_v50 = vsel %vm92_vm0, %v71_v26, -inf  ;;  %v119_v51 = vsel %vm92_vm0, %v75_v27, -inf }
  0x10   :  { %v114_v52 = vmax.f32 %v106_v44, %v113_v48  ;;  %v116_v53 = vmax.f32 %v108_v45, %v115_v49  ;;  %v118_v54 = vmax.f32 %v110_v46, %v117_v50  ;;  %v120_v55 = vmax.f32 %v112_v47, %v119_v51 }
  0x11   :  { %v133_v56 = vsel %vm92_vm0, %v15_v12, inf  ;;  %v134_v57 = vsel %vm92_vm0, %v19_v13, inf  ;;  %v135_v58 = vsel %vm92_vm0, %v23_v14, inf  ;;  %v136_v59 = vsel %vm92_vm0, %v27_v15, inf }
  0x12   :  { %v121_v60 = vmax.f32 %v114_v52, %v116_v53  ;;  %v122_v61 = vmax.f32 %v118_v54, %v120_v55  ;;  %v137_v62 = vsel %vm92_vm0, %v31_v16, inf  ;;  %v139_v63 = vsel %vm92_vm0, %v35_v17, inf }
  0x13   :  { %v138_v0 = vmin.f32 %v133_v56, %v137_v62  ;;  %v140_v1 = vmin.f32 %v134_v57, %v139_v63  ;;  %v141_v3 = vsel %vm92_vm0, %v39_v18, inf  ;;  %v143_v4 = vsel %vm92_vm0, %v43_v19, inf }
  0x14   :  { %v123_v5 = vmax.f32 %v121_v60, %v122_v61  ;;  %v142_v6 = vmin.f32 %v135_v58, %v141_v3  ;;  %v144_v8 = vmin.f32 %v136_v59, %v143_v4  ;;  %v145_v9 = vsel %vm92_vm0, %v47_v20, inf }
  0x15   :  { %v146_v10 = vmin.f32 %v138_v0, %v145_v9  ;;  %v147_v11 = vsel %vm92_vm0, %v51_v21, inf  ;;  %v149_v12 = vsel %vm92_vm0, %v55_v22, inf  ;;  %v151_v13 = vsel %vm92_vm0, %v59_v23, inf }
  0x16   :  { %124 = vmax.xlane.f32.xlu0 %v123_v5  ;;  %v148_v14 = vmin.f32 %v140_v1, %v147_v11  ;;  %v150_v15 = vmin.f32 %v142_v6, %v149_v12  ;;  %v152_v16 = vmin.f32 %v144_v8, %v151_v13  ;;  %v153_v17 = vsel %vm92_vm0, %v63_v24, inf }
  0x17   :  { %v154_v18 = vmin.f32 %v146_v10, %v153_v17  ;;  %v155_v19 = vsel %vm92_vm0, %v67_v25, inf  ;;  %v157_v28 = vsel %vm92_vm0, %v71_v26, inf  ;;  %v159_v20 = vsel %vm92_vm0, %v75_v27, inf }
  0x18   :  { %v156_v29 = vmin.f32 %v148_v14, %v155_v19  ;;  %v158_v30 = vmin.f32 %v150_v15, %v157_v28  ;;  %v160_v21 = vmin.f32 %v152_v16, %v159_v20 }
  0x1a   :  { %v161_v31 = vmin.f32 %v154_v18, %v156_v29  ;;  %v162_v22 = vmin.f32 %v158_v30, %v160_v21 }
  0x1c   :  { %v163_v32 = vmin.f32 %v161_v31, %v162_v22 }
  0x1e   :  { %164 = vmin.xlane.f32.xlu0 %v163_v32 }
  0xa3   :  { %v125_v23 = vpop.xlane.xlu0 %124 }
  0xa4   :  { %v126_v33 = vrot.slane %v125_v23, 4 }
  0xa6   :  { %v127_v34 = vmax.f32 %v125_v23, %v126_v33 }
  0xa8   :  { %v128_v35 = vrot.slane %v127_v34, 2 }
  0xaa   :  { %v129_v36 = vmax.f32 %v127_v34, %v128_v35 }
  0xab   :  { %v165_v24 = vpop.xlane.xlu0 %164 }
  0xac   :  { %v166_v37 = vrot.slane %v165_v24, 4  ;;  %v130_v38 = vrot.slane %v129_v36, 1 }
  0xae   :  { %v167_v25 = vmin.f32 %v165_v24, %v166_v37  ;;  %v131_v39 = vmax.f32 %v129_v36, %v130_v38 }
  0xb0   :  { %v168_v26 = vrot.slane %v167_v25, 2  ;;  %196 = vpush %v131_v39 }
  0xb2   :  { %v169_v27 = vmin.f32 %v167_v25, %v168_v26 }
  0xb4   :  { %v170_v40 = vrot.slane %v169_v27, 1 }
  0xb6   :  { %v171_v41 = vmin.f32 %v169_v27, %v170_v40 }
  0xb8   :  { %198 = vpush %v171_v41 }
  0xe1   :  { %s197_s0 = spop %196 }
  0xe9   :  { %s199_s10 = spop %198 }
  0xea   :  { %s173_s11 = ssub.f32 %s197_s0, %s199_s10 }
  0xec   :  { %v174_v42 = vstv %s173_s11 }
  0xed   :  { %204 = vrcp.f32 %v174_v42 }
  0xf7   :  { %v205_v43 = vpop.eup %204 }
  0xf8   :  { %200 = vpush %v205_v43 }
 0x129   :  { %s201_s12 = spop %200 }
 0x12a   :  { %s177_s13 = smul.f32 15.0, %s201_s12 }
 0x12c   :  { %v178_v44 = vstv %s177_s13 }
 0x12d   :  { %v179_v45 = vmul.f32 %v178_v44, %v221_v2  ;;  %v180_v46 = vmul.f32 %v178_v44, %v226_v7  ;;  %206 = vrcp.f32 %v178_v44 }
 0x12f   :  { %v181_v47 = vmax.f32 %v179_v45, -9.0  ;;  %v182_v48 = vmax.f32 %v180_v46, -9.0 }
 0x131   :  { %v183_v49 = vmin.f32 %v181_v47, 8.0  ;;  %v184_v50 = vmin.f32 %v182_v48, 8.0 }
 0x133   :  { %v202_v51 = vround.rtne.f32 %v183_v49  ;;  %v203_v52 = vround.rtne.f32 %v184_v50 }
 0x137   :  { %v207_v53 = vpop.eup %206 }
 0x138   :  { %v188_v54 = vmul.f32 %v207_v53, %v202_v51  ;;  %v189_v55 = vmul.f32 %v207_v53, %v203_v52 }
 0x13a   :  { %190 = vst [vmem:[%s285_s1] sm:$0xff] %v188_v54  ;;  %191 = vst [vmem:[%s285_s1 + $0x8] sm:$0xff] %v189_v55 }

</bundles_post_ra>
